<compile_context>
chip_gen: v7x
topology: tpu7x:2x2x1
jax: 0.10.0
libtpu: 0.0.40
codegen_flags: <defaults>
</compile_context>

<pallas_src>
import jax
import jax.numpy as jnp
from jax.experimental import pallas as pl
from jax.experimental.pallas import tpu as pltpu

HEAD_PAD = 128  # fused policy|value head output padded to a lane-dense width


def _round_up(n, m):
    return (n + m - 1) // m * m


def _mlp_kernel(x_ref,
                w1_ref, b1_ref,
                w2_ref, b2_ref,
                w3_ref, b3_ref,
                wh_ref, bh_ref,
                out_ref):
    """One batch tile: bf16 matmuls with f32 accumulation, f32 bias+ReLU."""
    x = x_ref[...]                                                  # (TB, 32) bf16

    h = jnp.dot(x, w1_ref[...], preferred_element_type=jnp.float32) + b1_ref[...]
    h = jnp.maximum(h, 0.0).astype(jnp.bfloat16)                    # (TB, 128)

    h = jnp.dot(h, w2_ref[...], preferred_element_type=jnp.float32) + b2_ref[...]
    h = jnp.maximum(h, 0.0).astype(jnp.bfloat16)                    # (TB, 64)

    h = jnp.dot(h, w3_ref[...], preferred_element_type=jnp.float32) + b3_ref[...]
    h = jnp.maximum(h, 0.0).astype(jnp.bfloat16)                    # (TB, 32)

    # Fused (policy | value | zero-pad) head: single MXU push, single
    # 128-lane unmasked store.
    out_ref[...] = (
        jnp.dot(h, wh_ref[...], preferred_element_type=jnp.float32) + bh_ref[...]
    )


def single_policy_value_net(x, params, *, batch_tile=1024):
    """Full forward in one pipelined Pallas call.

    Args:
      x: (batch, dim*2) float32 (or bfloat16).
      params: dict with (in, out) weights and (1, out) biases (see init_params).
      batch_tile: max rows per grid step (multiple of 8 recommended).
    Returns:
      {'policy': (batch, num_layers) f32, 'value': (batch, 1) f32}
    """
    batch, in_feat = x.shape
    num_layers = params["wp"].shape[1]
    n_head = num_layers + 1
    assert n_head <= HEAD_PAD, "num_layers + 1 must fit in the 128-lane head"

    # --- Fuse policy|value heads and zero-pad to a lane-dense 128 output. ---
    wh = jnp.concatenate([params["wp"], params["wv"]], axis=1)       # (32, L+1)
    bh = jnp.concatenate([params["bp"], params["bv"]], axis=1)       # (1,  L+1)
    wh = jnp.pad(wh, ((0, 0), (0, HEAD_PAD - n_head)))
    bh = jnp.pad(bh, ((0, 0), (0, HEAD_PAD - n_head)))

    # --- bf16 operands for the MXU; biases / accumulation stay f32. ---
    w1 = params["w1"].astype(jnp.bfloat16)
    w2 = params["w2"].astype(jnp.bfloat16)
    w3 = params["w3"].astype(jnp.bfloat16)
    wh = wh.astype(jnp.bfloat16)
    b1, b2, b3 = params["b1"], params["b2"], params["b3"]
    bh = bh.astype(jnp.float32)

    # --- Batch tiling: tile is a multiple of 8 sublanes; pad batch so the
    #     last tile is full (padded rows are sliced away afterwards). ---
    tile = min(batch_tile, _round_up(batch, 8))
    batch_p = _round_up(batch, tile)
    xp = x.astype(jnp.bfloat16)
    if batch_p != batch:
        xp = jnp.pad(xp, ((0, batch_p - batch), (0, 0)))

    grid = (batch_p // tile,)

    def _const(i):            # weights/biases: same block every step -> resident
        return (0, 0)

    in_specs = [
        pl.BlockSpec((tile, in_feat), lambda i: (i, 0)),   # x: pipelined tiles
        pl.BlockSpec(w1.shape, _const), pl.BlockSpec(b1.shape, _const),
        pl.BlockSpec(w2.shape, _const), pl.BlockSpec(b2.shape, _const),
        pl.BlockSpec(w3.shape, _const), pl.BlockSpec(b3.shape, _const),
        pl.BlockSpec(wh.shape, _const), pl.BlockSpec(bh.shape, _const),
    ]
    out_spec = pl.BlockSpec((tile, HEAD_PAD), lambda i: (i, 0))

    flops = 2 * batch_p * (in_feat * 128 + 128 * 64 + 64 * 32 + 32 * HEAD_PAD)
    weight_bytes = sum(int(a.size) * a.dtype.itemsize
                       for a in (w1, b1, w2, b2, w3, b3, wh, bh))
    bytes_accessed = int(xp.size) * 2 + batch_p * HEAD_PAD * 4 + weight_bytes

    out = pl.pallas_call(
        _mlp_kernel,
        out_shape=jax.ShapeDtypeStruct((batch_p, HEAD_PAD), jnp.float32),
        grid=grid,
        in_specs=in_specs,
        out_specs=out_spec,
        compiler_params=pltpu.CompilerParams(
            dimension_semantics=("parallel",)),
        cost_estimate=pl.CostEstimate(
            flops=flops, transcendentals=0, bytes_accessed=bytes_accessed),
    )(xp, w1, b1, w2, b2, w3, b3, wh, bh)

    return {
        "policy": out[:batch, :num_layers],
        "value": out[:batch, num_layers:n_head],
    }


def init_params(key, dim, num_layers):
    """Deterministic synthetic parameters matching the torch module's shapes.

    torch nn.Linear(in, out) -> weight (out, in), bias (out,).
    Here we store weight as (in, out) and bias as (1, out).
    """
    sizes = [
        ("w1", "b1", dim * 2, 128),
        ("w2", "b2", 128, 64),
        ("w3", "b3", 64, 32),
        ("wp", "bp", 32, num_layers),
        ("wv", "bv", 32, 1),
    ]
    params = {}
    for wname, bname, fan_in, fan_out in sizes:
        key, kw, kb = jax.random.split(key, 3)
        bound = 1.0 / jnp.sqrt(jnp.float32(fan_in))
        params[wname] = jax.random.uniform(
            kw, (fan_in, fan_out), jnp.float32, minval=-bound, maxval=bound
        )
        params[bname] = jax.random.uniform(
            kb, (1, fan_out), jnp.float32, minval=-bound, maxval=bound
        )
    return params


def reference_forward_f32(x, params):
    """Pure-f32 reference (matches the torch module exactly)."""
    h = jnp.maximum(x @ params["w1"] + params["b1"], 0.0)
    h = jnp.maximum(h @ params["w2"] + params["b2"], 0.0)
    h = jnp.maximum(h @ params["w3"] + params["b3"], 0.0)
    return {
        "policy": h @ params["wp"] + params["bp"],
        "value": h @ params["wv"] + params["bv"],
    }


def reference_forward_bf16(x, params):
    """Reference mirroring the kernel's bf16-operand / f32-accumulate numerics."""
    def mm(a, w):
        return jnp.dot(a.astype(jnp.bfloat16), w.astype(jnp.bfloat16),
                       preferred_element_type=jnp.float32)
    h = jnp.maximum(mm(x, params["w1"]) + params["b1"], 0.0)
    h = jnp.maximum(mm(h, params["w2"]) + params["b2"], 0.0)
    h = jnp.maximum(mm(h, params["w3"]) + params["b3"], 0.0)
    return {
        "policy": mm(h, params["wp"]) + params["bp"],
        "value": mm(h, params["wv"]) + params["bv"],
    }


if __name__ == "__main__":
    dim = 16          # torch module input is (batch, dim * 2)
    num_layers = 8
    batch = 2         # tiny demo batch; kernel pads to an 8-row sublane tile

    key = jax.random.PRNGKey(0)
    key, kx = jax.random.split(key)
    x = jax.random.normal(kx, (batch, dim * 2), jnp.float32)
    params = init_params(key, dim, num_layers)

    out = single_policy_value_net(x, params)
    out = jax.block_until_ready(out)

    assert out["policy"].shape == (batch, num_layers)
    assert out["value"].shape == (batch, 1)

    # Tight check against a reference with matching bf16-operand numerics.
    ref_bf16 = reference_forward_bf16(x, params)
    assert jnp.allclose(out["policy"], ref_bf16["policy"], atol=2e-3, rtol=2e-3)
    assert jnp.allclose(out["value"], ref_bf16["value"], atol=2e-3, rtol=2e-3)

    # Loose check against the pure-f32 torch-equivalent reference.
    ref_f32 = reference_forward_f32(x, params)
    assert jnp.allclose(out["policy"], ref_f32["policy"], atol=5e-2, rtol=5e-2)
    assert jnp.allclose(out["value"], ref_f32["value"], atol=5e-2, rtol=5e-2)

    print("KERNEL_OK")
</pallas_src>

<mosaic_0001>
module attributes {stable_mosaic.version = 11 : i64} {
  func.func @_mlp_kernel(%arg0: i32, %arg1: memref<8x32xbf16, #tpu.memory_space<vmem>>, %arg2: memref<32x128xbf16, #tpu.memory_space<vmem>>, %arg3: memref<1x128xf32, #tpu.memory_space<vmem>>, %arg4: memref<128x64xbf16, #tpu.memory_space<vmem>>, %arg5: memref<1x64xf32, #tpu.memory_space<vmem>>, %arg6: memref<64x32xbf16, #tpu.memory_space<vmem>>, %arg7: memref<1x32xf32, #tpu.memory_space<vmem>>, %arg8: memref<32x128xbf16, #tpu.memory_space<vmem>>, %arg9: memref<1x128xf32, #tpu.memory_space<vmem>>, %arg10: memref<8x128xf32, #tpu.memory_space<vmem>>) attributes {dimension_semantics = [#tpu.dimension_semantics<parallel>], iteration_bounds = array<i64: 1>, scalar_prefetch = 0 : i64, scratch_operands = 0 : i64, tpu.core_type = #tpu.core_type<tc>, window_params = [{transform_indices = @transform_0, window_bounds = array<i64: 8, 32>}, {pipeline_mode = #tpu.pipeline_mode<synchronous>, transform_indices = @transform_1, window_bounds = array<i64: 32, 128>}, {pipeline_mode = #tpu.pipeline_mode<synchronous>, transform_indices = @transform_2, window_bounds = array<i64: 1, 128>}, {pipeline_mode = #tpu.pipeline_mode<synchronous>, transform_indices = @transform_3, window_bounds = array<i64: 128, 64>}, {pipeline_mode = #tpu.pipeline_mode<synchronous>, transform_indices = @transform_4, window_bounds = array<i64: 1, 64>}, {pipeline_mode = #tpu.pipeline_mode<synchronous>, transform_indices = @transform_5, window_bounds = array<i64: 64, 32>}, {pipeline_mode = #tpu.pipeline_mode<synchronous>, transform_indices = @transform_6, window_bounds = array<i64: 1, 32>}, {pipeline_mode = #tpu.pipeline_mode<synchronous>, transform_indices = @transform_7, window_bounds = array<i64: 32, 128>}, {pipeline_mode = #tpu.pipeline_mode<synchronous>, transform_indices = @transform_8, window_bounds = array<i64: 1, 128>}, {transform_indices = @transform_9, window_bounds = array<i64: 8, 128>}]} {
    %c0 = arith.constant 0 : index
    %c0_0 = arith.constant 0 : index
    %0 = vector.load %arg1[%c0, %c0_0] : memref<8x32xbf16, #tpu.memory_space<vmem>>, vector<8x32xbf16>
    %c0_1 = arith.constant 0 : index
    %c0_2 = arith.constant 0 : index
    %1 = vector.load %arg2[%c0_1, %c0_2] : memref<32x128xbf16, #tpu.memory_space<vmem>>, vector<32x128xbf16>
    %cst = arith.constant dense<0.000000e+00> : vector<8x128xf32>
    %2 = tpu.matmul %0, %1, %cst {dimension_numbers = #tpu.dot_dimension_numbers<[1], [0], [0], [1], [0, 0, 1, 1], [], []>} : vector<8x32xbf16>, vector<32x128xbf16>, vector<8x128xf32> -> vector<8x128xf32>
    %c0_3 = arith.constant 0 : index
    %c0_4 = arith.constant 0 : index
    %3 = vector.load %arg3[%c0_3, %c0_4] : memref<1x128xf32, #tpu.memory_space<vmem>>, vector<1x128xf32>
    %4 = vector.broadcast %3 : vector<1x128xf32> to vector<8x128xf32>
    %5 = arith.addf %2, %4 : vector<8x128xf32>
    %cst_5 = arith.constant 0.000000e+00 : f32
    %6 = vector.broadcast %cst_5 : f32 to vector<8x128xf32>
    %7 = arith.maximumf %5, %6 : vector<8x128xf32>
    %8 = arith.truncf %7 : vector<8x128xf32> to vector<8x128xbf16>
    %c0_6 = arith.constant 0 : index
    %c0_7 = arith.constant 0 : index
    %9 = vector.load %arg4[%c0_6, %c0_7] : memref<128x64xbf16, #tpu.memory_space<vmem>>, vector<128x64xbf16>
    %cst_8 = arith.constant dense<0.000000e+00> : vector<8x64xf32>
    %10 = tpu.matmul %8, %9, %cst_8 {dimension_numbers = #tpu.dot_dimension_numbers<[1], [0], [0], [1], [0, 0, 1, 1], [], []>} : vector<8x128xbf16>, vector<128x64xbf16>, vector<8x64xf32> -> vector<8x64xf32>
    %c0_9 = arith.constant 0 : index
    %c0_10 = arith.constant 0 : index
    %11 = vector.load %arg5[%c0_9, %c0_10] : memref<1x64xf32, #tpu.memory_space<vmem>>, vector<1x64xf32>
    %12 = vector.broadcast %11 : vector<1x64xf32> to vector<8x64xf32>
    %13 = arith.addf %10, %12 : vector<8x64xf32>
    %cst_11 = arith.constant 0.000000e+00 : f32
    %14 = vector.broadcast %cst_11 : f32 to vector<8x64xf32>
    %15 = arith.maximumf %13, %14 : vector<8x64xf32>
    %16 = arith.truncf %15 : vector<8x64xf32> to vector<8x64xbf16>
    %c0_12 = arith.constant 0 : index
    %c0_13 = arith.constant 0 : index
    %17 = vector.load %arg6[%c0_12, %c0_13] : memref<64x32xbf16, #tpu.memory_space<vmem>>, vector<64x32xbf16>
    %cst_14 = arith.constant dense<0.000000e+00> : vector<8x32xf32>
    %18 = tpu.matmul %16, %17, %cst_14 {dimension_numbers = #tpu.dot_dimension_numbers<[1], [0], [0], [1], [0, 0, 1, 1], [], []>} : vector<8x64xbf16>, vector<64x32xbf16>, vector<8x32xf32> -> vector<8x32xf32>
    %c0_15 = arith.constant 0 : index
    %c0_16 = arith.constant 0 : index
    %19 = vector.load %arg7[%c0_15, %c0_16] : memref<1x32xf32, #tpu.memory_space<vmem>>, vector<1x32xf32>
    %20 = vector.broadcast %19 : vector<1x32xf32> to vector<8x32xf32>
    %21 = arith.addf %18, %20 : vector<8x32xf32>
    %cst_17 = arith.constant 0.000000e+00 : f32
    %22 = vector.broadcast %cst_17 : f32 to vector<8x32xf32>
    %23 = arith.maximumf %21, %22 : vector<8x32xf32>
    %24 = arith.truncf %23 : vector<8x32xf32> to vector<8x32xbf16>
    %c0_18 = arith.constant 0 : index
    %c0_19 = arith.constant 0 : index
    %25 = vector.load %arg8[%c0_18, %c0_19] : memref<32x128xbf16, #tpu.memory_space<vmem>>, vector<32x128xbf16>
    %cst_20 = arith.constant dense<0.000000e+00> : vector<8x128xf32>
    %26 = tpu.matmul %24, %25, %cst_20 {dimension_numbers = #tpu.dot_dimension_numbers<[1], [0], [0], [1], [0, 0, 1, 1], [], []>} : vector<8x32xbf16>, vector<32x128xbf16>, vector<8x128xf32> -> vector<8x128xf32>
    %c0_21 = arith.constant 0 : index
    %c0_22 = arith.constant 0 : index
    %27 = vector.load %arg9[%c0_21, %c0_22] : memref<1x128xf32, #tpu.memory_space<vmem>>, vector<1x128xf32>
    %28 = vector.broadcast %27 : vector<1x128xf32> to vector<8x128xf32>
    %29 = arith.addf %26, %28 : vector<8x128xf32>
    %c0_23 = arith.constant 0 : index
    %c0_24 = arith.constant 0 : index
    %30 = vector.load %arg10[%c0_23, %c0_24] : memref<8x128xf32, #tpu.memory_space<vmem>>, vector<8x128xf32>
    tpu.vector_store %arg10[%c0_23, %c0_24], %29 {strides = array<i32>} : memref<8x128xf32, #tpu.memory_space<vmem>>, vector<8x128xf32>,
    return
  }
  func.func @transform_0(%arg0: i32) -> (i32, i32) {
    %c0_i32 = arith.constant 0 : i32
    %c0_i32_0 = arith.constant 0 : i32
    return %arg0, %c0_i32 : i32, i32
  }
  func.func @transform_1(%arg0: i32) -> (i32, i32) {
    %c0_i32 = arith.constant 0 : i32
    %c0_i32_0 = arith.constant 0 : i32
    %c0_i32_1 = arith.constant 0 : i32
    return %c0_i32, %c0_i32_0 : i32, i32
  }
  func.func @transform_2(%arg0: i32) -> (i32, i32) {
    %c0_i32 = arith.constant 0 : i32
    %c0_i32_0 = arith.constant 0 : i32
    %c0_i32_1 = arith.constant 0 : i32
    return %c0_i32, %c0_i32_0 : i32, i32
  }
  func.func @transform_3(%arg0: i32) -> (i32, i32) {
    %c0_i32 = arith.constant 0 : i32
    %c0_i32_0 = arith.constant 0 : i32
    %c0_i32_1 = arith.constant 0 : i32
    return %c0_i32, %c0_i32_0 : i32, i32
  }
  func.func @transform_4(%arg0: i32) -> (i32, i32) {
    %c0_i32 = arith.constant 0 : i32
    %c0_i32_0 = arith.constant 0 : i32
    %c0_i32_1 = arith.constant 0 : i32
    return %c0_i32, %c0_i32_0 : i32, i32
  }
  func.func @transform_5(%arg0: i32) -> (i32, i32) {
    %c0_i32 = arith.constant 0 : i32
    %c0_i32_0 = arith.constant 0 : i32
    %c0_i32_1 = arith.constant 0 : i32
    return %c0_i32, %c0_i32_0 : i32, i32
  }
  func.func @transform_6(%arg0: i32) -> (i32, i32) {
    %c0_i32 = arith.constant 0 : i32
    %c0_i32_0 = arith.constant 0 : i32
    %c0_i32_1 = arith.constant 0 : i32
    return %c0_i32, %c0_i32_0 : i32, i32
  }
  func.func @transform_7(%arg0: i32) -> (i32, i32) {
    %c0_i32 = arith.constant 0 : i32
    %c0_i32_0 = arith.constant 0 : i32
    %c0_i32_1 = arith.constant 0 : i32
    return %c0_i32, %c0_i32_0 : i32, i32
  }
  func.func @transform_8(%arg0: i32) -> (i32, i32) {
    %c0_i32 = arith.constant 0 : i32
    %c0_i32_0 = arith.constant 0 : i32
    %c0_i32_1 = arith.constant 0 : i32
    return %c0_i32, %c0_i32_0 : i32, i32
  }
  func.func @transform_9(%arg0: i32) -> (i32, i32) {
    %c0_i32 = arith.constant 0 : i32
    %c0_i32_0 = arith.constant 0 : i32
    return %arg0, %c0_i32 : i32, i32
  }
}

</mosaic_0001>

<bundles_post_ra>
// kernel: tpu_custom_call.1
= control target key start
LH: loop header
LB: loop body
LE: loop exit
PB: predicated region body
PF: predicated region fallthrough
CT: control target
= control target key end

     0   :  { %v517_v1 = vmov 0.0   ;;  %vm518_vm0 = vmmov 0   ;;  %vm58_vm1 = vcmask 261120   ;;  %s671_s0 = inlined_call_operand.vmem [shape: bf16[8,32], index: 0, kind: input, shape index: {}]   ;;  %s672_s1 = inlined_call_operand.vmem [shape: bf16[32,128], index: 1, kind: input, shape index: {}]   ;;  %s673_s2 = inlined_call_operand.vmem [shape: f32[1,128], index: 2, kind: input, shape index: {}]   ;;  %s674_s3 = inlined_call_operand.vmem [shape: bf16[128,64], index: 3, kind: input, shape index: {}]   ;;  %s675_s4 = inlined_call_operand.vmem [shape: f32[1,64], index: 4, kind: input, shape index: {}]   ;;  %s676_s5 = inlined_call_operand.vmem [shape: bf16[64,32], index: 5, kind: input, shape index: {}]   ;;  %s677_s6 = inlined_call_operand.vmem [shape: f32[1,32], index: 6, kind: input, shape index: {}]   ;;  %s678_s7 = inlined_call_operand.vmem [shape: bf16[32,128], index: 7, kind: input, shape index: {}]   ;;  %s679_s8 = inlined_call_operand.vmem [shape: f32[1,128], index: 8, kind: input, shape index: {}]   ;;  %s680_s9 = inlined_call_operand.hbm [shape: f32[8,128], index: 9, kind: output, shape index: {}]  }
   0x1   :  { %v477_v0 = vld [vmem:[%s672_s1] sm:$0xff]   ;;  %426 = vmatprep.subr.bf16.mxu0 %v517_v1  ;;  %434 = vmatprep.subr.bf16.mxu1 %v517_v1  ;;  %v478_v2 = vld [vmem:[%s672_s1 + $0x8] sm:$0xff]   ;;  %v481_v6 = vld [vmem:[%s674_s3 + $0x10] sm:$0xff]  }
   0x2   :  { %427 = vmatpush3.bf16.msra.mxu0 %v477_v0  ;;  %430 = vmatprep.mubr.msk.bf16.mxu0 %vm518_vm0, %v517_v1  ;;  %v479_v3 = vld [vmem:[%s674_s3] sm:$0xff]   ;;  %v480_v4 = vld [vmem:[%s674_s3 + $0x8] sm:$0xff]   ;;  %v482_v7 = vld [vmem:[%s674_s3 + $0x18] sm:$0xff]  }
   0x3   :  { %428 = vmatprep.subr.bf16.mxu0 %v517_v1  ;;  %450 = vmatprep.mubr.msk.bf16.mxu1 %vm518_vm0, %v517_v1  ;;  %v34_v5 = vld [vmem:[%s671_s0] sm:$0xf] }
   0x4   :  { %435 = vmatpush3.bf16.msra.mxu1 %v479_v3 }
   0x5   :  { %436 = vmatprep.subr.bf16.mxu1 %v517_v1 }
   0x6   :  { %429 = vmatpush3.bf16.msra.mxu0 %v478_v2 }
   0x7   :  { %454 = vmatprep.subr.bf16.mxu0 %v517_v1 }
   0x8   :  { %437 = vmatpush3.bf16.msra.mxu1 %v480_v4 }
   0x9   :  { %431 = vmatmul.mubr.msk.bf16.vlgmr.msra.gmra.mrb[0].mxu0 %vm58_vm1, %v34_v5  ;;  %438 = vmatprep.subr.bf16.mxu1 %v517_v1 }
   0xa   :  { %462 = vmatprep.mubr.msk.bf16.mxu0 %vm518_vm0, %v517_v1 }
   0xc   :  { %439 = vmatpush3.bf16.msra.mxu1 %v481_v6 }
   0xd   :  { %440 = vmatprep.subr.bf16.mxu1 %v517_v1 }
   0xe   :  { %14 = vsyncpa [#allocation3], 0  ;;  %v483_v8 = vld [vmem:[%s674_s3 + $0x20] sm:$0xff]   ;;  %v484_v9 = vld [vmem:[%s674_s3 + $0x28] sm:$0xff]   ;;  %vm256_vm2 = vcmask 523264   ;;  %s519_s22 = smov [#allocation2]  }
   0xf   :  { %v485_v10 = vld [vmem:[%s674_s3 + $0x30] sm:$0xff]   ;;  %v486_v11 = vld [vmem:[%s674_s3 + $0x38] sm:$0xff]   ;;  %v487_v12 = vld [vmem:[%s676_s5] sm:$0xff]  }
  0x10   :  { %441 = vmatpush3.bf16.msra.mxu1 %v482_v7  ;;  %455 = vmatpush3.bf16.msra.mxu0 %v487_v12  ;;  %v488_v13 = vld [vmem:[%s676_s5 + $0x8] sm:$0xff]   ;;  %v383_v14 = vld [vmem:[%s673_s2] ss:$0 sm:$0xff]  ;;  %v489_v22 = vld [vmem:[%s676_s5 + $0x10] sm:$0xff]  }
  0x11   :  { %442 = vmatprep.subr.bf16.mxu1 %v517_v1  ;;  %456 = vmatprep.subr.bf16.mxu0 %v517_v1  ;;  %v490_v23 = vld [vmem:[%s676_s5 + $0x18] sm:$0xff]   ;;  %v387_v24 = vld [vmem:[%s675_s4] ss:$0 sm:$0xff]  ;;  %v492_v33 = vld [vmem:[%s678_s7 + $0x8] sm:$0xff]  }
  0x12   :  { %v491_v31 = vld [vmem:[%s678_s7] sm:$0xff]   ;;  %s375_s7 = sshll.u32 %s519_s22, 4  ;;  %s376_s7 = int_to_ptr.vmem [resolvable:$true] %s375_s7 }
  0x13   :  { %v396_v34 = vld [vmem:[%s677_s6] ss:$0 sm:$0xff]  ;;  %s493_s6 = scalar_lea.vmem %s376_s7, 128  ;;  %p498_p1 = scmp.lt.s32.totalorder %s376_s7, %s376_s7 }
  0x14   :  { %443 = vmatpush3.bf16.msra.mxu1 %v483_v8  ;;  %457 = vmatpush3.bf16.msra.mxu0 %v488_v13  ;;  %v402_v42 = vld [vmem:[%s679_s8] ss:$0 sm:$0xff]  ;;  %p494_p0 = scmp.ne.s32.totalorder %s376_s7, %s493_s6  ;;  %p499_p2 = scmp.lt.s32.totalorder %s493_s6, %s493_s6 }
  0x15   :  { %444 = vmatprep.subr.bf16.mxu1 %v517_v1  ;;  %458 = vmatprep.subr.bf16.mxu0 %v517_v1 }
  0x16   :  { %p500_p3 = por %p499_p2, %p498_p1 }
  0x18   :  { %445 = vmatpush3.bf16.msra.mxu1 %v484_v9  ;;  %459 = vmatpush3.bf16.msra.mxu0 %v489_v22  ;;  %p501_p4 = pnand %p500_p3, %p494_p0 }
  0x19   :  { %446 = vmatprep.subr.bf16.mxu1 %v517_v1  ;;  %460 = vmatprep.subr.bf16.mxu0 %v517_v1 }
  0x1c   :  { %447 = vmatpush3.bf16.msra.mxu1 %v485_v10  ;;  %461 = vmatpush3.bf16.msra.mxu0 %v490_v23 }
  0x1d   :  { %448 = vmatprep.subr.bf16.mxu1 %v517_v1  ;;  %466 = vmatprep.subr.bf16.mxu0 %v517_v1 }
  0x20   :  { %449 = vmatpush3.bf16.msra.mxu1 %v486_v11 }
  0xdc   :  { %v96_v15 = vpop.f32.mrb[0].mxu0 }
  0xdd   :  { %v97_v16 = vadd.f32 %v383_v14, %v96_v15  ;;  %v432_v17 = vpop.f32.mrb[1].mxu0 }
  0xde   :  { %v99_v18 = vpop.f32.mrb[2].mxu0 }
  0xdf   :  { %v102_v19 = vmax.f32 %v97_v16, 0.0  ;;  %v433_v20 = vpop.f32.mrb[3].mxu0 }
  0xe1   :  { %v103_v21 = vpack.c.bf16 %v102_v19, %v102_v19 }
  0xe3   :  { %451 = vmatmul.mubr.bf16.vlgmr.msra.gmra.mrb[0].mxu1 %v103_v21 }
 0x1b6   :  { %v209_v25 = vpop.f32.mrb[0].mxu1 }
 0x1b7   :  { %v210_v26 = vadd.f32 %v387_v24, %v209_v25  ;;  %v452_v27 = vpop.f32.mrb[1].mxu1 }
 0x1b8   :  { %v212_v28 = vpop.f32.mrb[2].mxu1 }
 0x1b9   :  { %v215_v29 = vmax.f32 %v210_v26, 0.0  ;;  %v453_v30 = vpop.f32.mrb[3].mxu1 }
 0x1bb   :  { %v216_v32 = vpack.c.bf16 %v215_v29, %v215_v29 }
 0x1bd   :  { %463 = vmatmul.mubr.msk.bf16.vlgmr.msra.gmra.mrb[4].mxu0 %vm256_vm2, %v216_v32 }
 0x1be   :  { %467 = vmatpush3.bf16.msra.mxu0 %v491_v31  ;;  %470 = vmatprep.mubr.msk.bf16.mxu0 %vm518_vm0, %v517_v1 }
 0x1bf   :  { %468 = vmatprep.subr.bf16.mxu0 %v517_v1 }
 0x1c2   :  { %469 = vmatpush3.bf16.msra.mxu0 %v492_v33 }
 0x290   :  { %v294_v35 = vpop.f32.mrb[4].mxu0 }
 0x291   :  { %v295_v36 = vadd.f32 %v396_v34, %v294_v35  ;;  %v464_v37 = vpop.f32.mrb[5].mxu0 }
 0x292   :  { %v297_v38 = vpop.f32.mrb[6].mxu0 }
 0x293   :  { %v300_v39 = vmax.f32 %v295_v36, 0.0  ;;  %v465_v40 = vpop.f32.mrb[7].mxu0 }
 0x295   :  { %v301_v41 = vpack.c.bf16 %v300_v39, %v300_v39 }
 0x297   :  { %471 = vmatmul.mubr.msk.bf16.vlgmr.msra.gmra.mrb[8].mxu0 %vm58_vm1, %v301_v41 }
 0x36a   :  { %v362_v43 = vpop.f32.mrb[8].mxu0 }
 0x36b   :  { %v363_v44 = vadd.f32 %v402_v42, %v362_v43  ;;  %v472_v45 = vpop.f32.mrb[9].mxu0 }
 0x36c   :  { %v365_v46 = vpop.f32.mrb[10].mxu0 }
 0x36d   :  { %368 = vst [vmem:[#allocation2] sm:$0xff] %v363_v44  ;;  %v473_v47 = vpop.f32.mrb[11].mxu0 }
 0x36e   :  { %504 = shalt.err (!%p501_p4)
}
 0x36f   :  { %s505_s8 = scalar_lea.hbm %s680_s9, 128 }
 0x370   :  { %p506_p5 = scmp.ne.s32.totalorder %s680_s9, %s505_s8  ;;  %p509_p6 = scmp.lt.u32.totalorder %s505_s8, %s680_s9 }
 0x372   :  { %p511_p7 = pnand %p509_p6, %p506_p5 }
 0x374   :  { %514 = shalt.err (!%p511_p7)
}
 0x375   :  { %378 = dma.vmem_to_hbm [thread:$0]  %s376_s7, 128, %s680_s9, [#allocation3]  }
 0x376   :  { %515 = dma.done.wait [#allocation3], 128  }
 0x377   :  { %516 = vsyncadd [#allocation3], 4294967168 }
 0x378   :  { %382 = vsyncpa [#allocation3], 1 }

</bundles_post_ra>
